<compile_context>
chip_gen: v5e
topology: v5e:2x2
jax: 0.10.0
libtpu: 0.0.40
codegen_flags: <defaults>
</compile_context>

<pallas_src>
import functools

import jax
import jax.numpy as jnp
from jax import lax
from jax.experimental import pallas as pl
from jax.experimental.pallas import tpu as pltpu
import numpy as np


def _round_up(a, m):
    return (a + m - 1) // m * m


def _trend_kernel(tre_layer, thetas_dim, backcast_length, total_length,
                  x_ref, w1_ref, b1_ref, w2_ref, b2_ref, w3_ref, b3_ref,
                  w4_ref, b4_ref, hwf_ref, hbf_ref, t_ref, out_ref):
    TB = x_ref.shape[0]
    Lp = x_ref.shape[1]              # lane-padded backcast+forecast length
    td = thetas_dim
    units = w1_ref.shape[-1]

    # Combined state: lanes [0, backcast) hold res_x, lanes [backcast, L) the
    # running forecast, lanes [L, Lp) are zero padding (stay zero throughout:
    # w1 rows there are zero and the basis rows there are zero).
    combined = x_ref[...].astype(jnp.float32)

    # bf16 MXU operands (cast / padded in the wrapper).
    w1 = w1_ref[...]                 # (Lp, units), rows >= backcast zeroed
    w2 = w2_ref[...]
    w3 = w3_ref[...]
    w4 = w4_ref[...]
    hwf = hwf_ref[...]               # (units, td*td) fused trend heads

    # Hoist broadcasts out of the residual loop (JAX does not CSE them).
    b1 = jnp.broadcast_to(b1_ref[...], (TB, units))
    b2 = jnp.broadcast_to(b2_ref[...], (TB, units))
    b3 = jnp.broadcast_to(b3_ref[...], (TB, units))
    b4 = jnp.broadcast_to(b4_ref[...], (TB, units))
    hbf = jnp.broadcast_to(hbf_ref[...], (TB, td * td))
    t_rows = [jnp.broadcast_to(t_ref[j:j + 1, :], (TB, Lp)) for j in range(td)]

    # res_x -= z_back ; forecast += z_fore   ==   combined += sign * multi_out
    # (pad lanes get sign=+1 but multi_out there is exactly 0: basis is zero.)
    lane = lax.broadcasted_iota(jnp.int32, (TB, Lp), 1)
    sign = jnp.where(lane < backcast_length, -1.0, 1.0).astype(jnp.float32)

    # tre_layer is small and static -> trace-time unroll is fine.
    for _ in range(tre_layer):
        # fc1 consumes the whole combined slab; forecast / pad lanes are
        # annihilated by the zero-padded weight rows (no lane slice needed).
        h = jnp.dot(combined.astype(jnp.bfloat16), w1,
                    preferred_element_type=jnp.float32) + b1
        h = jnp.maximum(h, 0.0)
        h = jnp.dot(h.astype(jnp.bfloat16), w2,
                    preferred_element_type=jnp.float32) + b2
        h = jnp.maximum(h, 0.0)
        h = jnp.dot(h.astype(jnp.bfloat16), w3,
                    preferred_element_type=jnp.float32) + b3
        h = jnp.maximum(h, 0.0)
        h = jnp.dot(h.astype(jnp.bfloat16), w4,
                    preferred_element_type=jnp.float32) + b4
        h = jnp.maximum(h, 0.0)

        # All thetas_dim trend heads fused into one MXU matmul.
        feat = jnp.dot(h.astype(jnp.bfloat16), hwf,
                       preferred_element_type=jnp.float32) + hbf
        feat = jnp.maximum(feat, 0.0)                      # (TB, td*td)

        # Exact factorization: sum_i relu(.) @ T == (sum_i relu(.)) @ T.
        feat_sum = feat[:, 0:td]
        for hh in range(1, td):
            feat_sum = feat_sum + feat[:, hh * td:(hh + 1) * td]

        # Basis projection on the VPU (K = thetas_dim <= 4 would waste the MXU).
        multi_out = feat_sum[:, 0:1] * t_rows[0]
        for j in range(1, td):
            multi_out = multi_out + feat_sum[:, j:j + 1] * t_rows[j]

        combined = combined + sign * multi_out

    out_ref[...] = combined


def trend_module_forward(x, params, *, tre_layer, thetas_dim,
                         backcast_length, forecast_length):
    B = x.shape[0]
    units = params["w1"].shape[-1]
    td = thetas_dim
    L = backcast_length + forecast_length
    Lp = _round_up(L, 128)           # lane-dense slab -> unmasked stores

    # Flatten the per-head weights into one matmul operand.
    # hw: (td, units, td) -> (units, td*td), column index = head*td + theta.
    hw_flat = jnp.transpose(params["hw"], (1, 0, 2)).reshape(units, td * td)
    hb_flat = jnp.transpose(params["hb"], (1, 0, 2)).reshape(1, td * td)

    # fc1 weight zero-padded to (Lp, units): forecast / pad lanes of the
    # combined slab contribute exactly zero, so the kernel needs no lane slice.
    w1_pad = jnp.zeros((Lp, units), jnp.float32)
    w1_pad = w1_pad.at[:backcast_length, :].set(params["w1"].astype(jnp.float32))

    # Polynomial basis zero-padded on pad lanes -> multi_out is 0 there.
    t_pad = jnp.zeros((td, Lp), jnp.float32)
    t_pad = t_pad.at[:, :L].set(params["t_basis"].astype(jnp.float32))

    # bf16 MXU inputs; biases / basis stay f32 (f32 accumulation in-kernel).
    w1 = w1_pad.astype(jnp.bfloat16)
    w2 = params["w2"].astype(jnp.bfloat16)
    w3 = params["w3"].astype(jnp.bfloat16)
    w4 = params["w4"].astype(jnp.bfloat16)
    hw_flat = hw_flat.astype(jnp.bfloat16)
    b1 = params["b1"].astype(jnp.float32)
    b2 = params["b2"].astype(jnp.float32)
    b3 = params["b3"].astype(jnp.float32)
    b4 = params["b4"].astype(jnp.float32)
    hb_flat = hb_flat.astype(jnp.float32)

    # Batch tiling: one lane-dense (TB, Lp) block per grid step; "parallel"
    # lets the grid shard across TensorCores on v7x.
    TB = min(256, _round_up(B, 8))
    B_pad = _round_up(B, TB)
    grid = (B_pad // TB,)

    # Single input/output slab (B_pad, Lp): x on the backcast lanes, zeros on
    # the forecast lanes (== initial forecast accumulator) and pad lanes.
    x_slab = jnp.zeros((B_pad, Lp), jnp.float32)
    x_slab = x_slab.at[:B, :backcast_length].set(x.astype(jnp.float32))

    kernel = functools.partial(_trend_kernel, tre_layer, td,
                               backcast_length, L)

    args = (x_slab, w1, b1, w2, b2, w3, b3, w4, b4, hw_flat, hb_flat, t_pad)
    in_specs = [
        pl.BlockSpec((TB, Lp), lambda i: (i, 0)),          # x slab
        pl.BlockSpec((Lp, units), lambda i: (0, 0)),       # w1 (padded)
        pl.BlockSpec((1, units), lambda i: (0, 0)),        # b1
        pl.BlockSpec((units, units), lambda i: (0, 0)),    # w2
        pl.BlockSpec((1, units), lambda i: (0, 0)),        # b2
        pl.BlockSpec((units, units), lambda i: (0, 0)),    # w3
        pl.BlockSpec((1, units), lambda i: (0, 0)),        # b3
        pl.BlockSpec((units, units), lambda i: (0, 0)),    # w4
        pl.BlockSpec((1, units), lambda i: (0, 0)),        # b4
        pl.BlockSpec((units, td * td), lambda i: (0, 0)),  # hw_flat
        pl.BlockSpec((1, td * td), lambda i: (0, 0)),      # hb_flat
        pl.BlockSpec((td, Lp), lambda i: (0, 0)),          # t_basis (padded)
    ]
    out_specs = pl.BlockSpec((TB, Lp), lambda i: (i, 0))

    flops = int(tre_layer * B_pad * 2
                * (Lp * units + 3 * units * units
                   + units * td * td + td * Lp))
    bytes_accessed = int(sum(a.size * a.dtype.itemsize for a in args)
                         + B_pad * Lp * 4)

    combined = pl.pallas_call(
        kernel,
        out_shape=jax.ShapeDtypeStruct((B_pad, Lp), jnp.float32),
        grid=grid,
        in_specs=in_specs,
        out_specs=out_specs,
        compiler_params=pltpu.CompilerParams(
            dimension_semantics=("parallel",)),
        cost_estimate=pl.CostEstimate(
            flops=flops, transcendentals=0, bytes_accessed=bytes_accessed),
    )(*args)

    combined = combined[:B]
    return combined[:, :backcast_length], combined[:, backcast_length:L]


def reference_forward(x, params, *, tre_layer, thetas_dim,
                      backcast_length, forecast_length):
    # Pure-JAX f32 mirror of the PyTorch forward, for validation.
    res_x = x
    forecast = jnp.zeros((x.shape[0], forecast_length), jnp.float32)
    T = params["t_basis"]
    for _ in range(tre_layer):
        out = jax.nn.relu(res_x @ params["w1"] + params["b1"])
        out = jax.nn.relu(out @ params["w2"] + params["b2"])
        out = jax.nn.relu(out @ params["w3"] + params["b3"])
        out = jax.nn.relu(out @ params["w4"] + params["b4"])
        multi_out = jnp.zeros((x.shape[0], T.shape[-1]), jnp.float32)
        for i in range(thetas_dim):
            feat = jax.nn.relu(out @ params["hw"][i] + params["hb"][i])
            multi_out = multi_out + feat @ T
        res_x = res_x - multi_out[:, :backcast_length]
        forecast = forecast + multi_out[:, backcast_length:]
    return res_x, forecast


def make_params(key, *, units, thetas_dim, backcast_length, forecast_length):
    L = backcast_length + forecast_length
    ks = jax.random.split(key, 10)
    scale = 0.1

    def lin(k, fan_in, fan_out):
        return scale * jax.random.normal(k, (fan_in, fan_out), jnp.float32)

    params = {
        "w1": lin(ks[0], backcast_length, units),
        "b1": scale * jax.random.normal(ks[1], (1, units), jnp.float32),
        "w2": lin(ks[2], units, units),
        "b2": scale * jax.random.normal(ks[3], (1, units), jnp.float32),
        "w3": lin(ks[4], units, units),
        "b3": scale * jax.random.normal(ks[5], (1, units), jnp.float32),
        "w4": lin(ks[6], units, units),
        "b4": scale * jax.random.normal(ks[7], (1, units), jnp.float32),
        "hw": scale * jax.random.normal(
            ks[8], (thetas_dim, units, thetas_dim), jnp.float32),
        "hb": scale * jax.random.normal(
            ks[9], (thetas_dim, 1, thetas_dim), jnp.float32),
    }
    # Polynomial trend basis: T[i, :] = t**i, t = linspace(-backcast, horizon, L)
    t = np.linspace(-backcast_length, forecast_length, L)
    t_basis = np.stack([t ** i for i in range(thetas_dim)], axis=0)
    params["t_basis"] = jnp.asarray(t_basis, jnp.float32)
    return params


if __name__ == "__main__":
    # Small shapes consistent with the module's forward.
    B = 8
    units = 32
    thetas_dim = 4          # module asserts thetas_dim <= 4
    backcast_length = 16    # look_back
    forecast_length = 8     # horizon
    tre_layer = 2

    key = jax.random.PRNGKey(0)
    kx, kp = jax.random.split(key)
    x = jax.random.normal(kx, (B, backcast_length), jnp.float32)
    params = make_params(kp, units=units, thetas_dim=thetas_dim,
                         backcast_length=backcast_length,
                         forecast_length=forecast_length)

    res_x, forecast = trend_module_forward(
        x, params, tre_layer=tre_layer, thetas_dim=thetas_dim,
        backcast_length=backcast_length, forecast_length=forecast_length)
    jax.block_until_ready((res_x, forecast))

    ref_res, ref_fc = reference_forward(
        x, params, tre_layer=tre_layer, thetas_dim=thetas_dim,
        backcast_length=backcast_length, forecast_length=forecast_length)

    # bf16 MXU inputs (f32 accumulation) => compare with a scale-relative
    # tolerance; the polynomial basis amplifies values by up to |t|^3.
    for name, got, ref in (("res_x", res_x, ref_res),
                           ("forecast", forecast, ref_fc)):
        got_np = np.asarray(got)
        ref_np = np.asarray(ref)
        atol = 5e-2 * (float(np.max(np.abs(ref_np))) + 1e-6)
        np.testing.assert_allclose(got_np, ref_np, rtol=5e-2, atol=atol,
                                   err_msg=name)
    print("KERNEL_OK")
</pallas_src>

<mosaic_0001>
module attributes {stable_mosaic.version = 11 : i64} {
  func.func @_trend_kernel(%arg0: i32, %arg1: memref<8x128xf32, #tpu.memory_space<vmem>>, %arg2: memref<128x32xbf16, #tpu.memory_space<vmem>>, %arg3: memref<1x32xf32, #tpu.memory_space<vmem>>, %arg4: memref<32x32xbf16, #tpu.memory_space<vmem>>, %arg5: memref<1x32xf32, #tpu.memory_space<vmem>>, %arg6: memref<32x32xbf16, #tpu.memory_space<vmem>>, %arg7: memref<1x32xf32, #tpu.memory_space<vmem>>, %arg8: memref<32x32xbf16, #tpu.memory_space<vmem>>, %arg9: memref<1x32xf32, #tpu.memory_space<vmem>>, %arg10: memref<32x16xbf16, #tpu.memory_space<vmem>>, %arg11: memref<1x16xf32, #tpu.memory_space<vmem>>, %arg12: memref<4x128xf32, #tpu.memory_space<vmem>>, %arg13: memref<8x128xf32, #tpu.memory_space<vmem>>) attributes {dimension_semantics = [#tpu.dimension_semantics<parallel>], iteration_bounds = array<i64: 1>, scalar_prefetch = 0 : i64, scratch_operands = 0 : i64, tpu.core_type = #tpu.core_type<tc>, window_params = [{transform_indices = @transform_0, window_bounds = array<i64: 8, 128>}, {pipeline_mode = #tpu.pipeline_mode<synchronous>, transform_indices = @transform_1, window_bounds = array<i64: 128, 32>}, {pipeline_mode = #tpu.pipeline_mode<synchronous>, transform_indices = @transform_2, window_bounds = array<i64: 1, 32>}, {pipeline_mode = #tpu.pipeline_mode<synchronous>, transform_indices = @transform_3, window_bounds = array<i64: 32, 32>}, {pipeline_mode = #tpu.pipeline_mode<synchronous>, transform_indices = @transform_4, window_bounds = array<i64: 1, 32>}, {pipeline_mode = #tpu.pipeline_mode<synchronous>, transform_indices = @transform_5, window_bounds = array<i64: 32, 32>}, {pipeline_mode = #tpu.pipeline_mode<synchronous>, transform_indices = @transform_6, window_bounds = array<i64: 1, 32>}, {pipeline_mode = #tpu.pipeline_mode<synchronous>, transform_indices = @transform_7, window_bounds = array<i64: 32, 32>}, {pipeline_mode = #tpu.pipeline_mode<synchronous>, transform_indices = @transform_8, window_bounds = array<i64: 1, 32>}, {pipeline_mode = #tpu.pipeline_mode<synchronous>, transform_indices = @transform_9, window_bounds = array<i64: 32, 16>}, {pipeline_mode = #tpu.pipeline_mode<synchronous>, transform_indices = @transform_10, window_bounds = array<i64: 1, 16>}, {pipeline_mode = #tpu.pipeline_mode<synchronous>, transform_indices = @transform_11, window_bounds = array<i64: 4, 128>}, {transform_indices = @transform_12, window_bounds = array<i64: 8, 128>}]} {
    %c0 = arith.constant 0 : index
    %c0_0 = arith.constant 0 : index
    %0 = vector.load %arg1[%c0, %c0_0] : memref<8x128xf32, #tpu.memory_space<vmem>>, vector<8x128xf32>
    %c0_1 = arith.constant 0 : index
    %c0_2 = arith.constant 0 : index
    %1 = vector.load %arg2[%c0_1, %c0_2] : memref<128x32xbf16, #tpu.memory_space<vmem>>, vector<128x32xbf16>
    %c0_3 = arith.constant 0 : index
    %c0_4 = arith.constant 0 : index
    %2 = vector.load %arg4[%c0_3, %c0_4] : memref<32x32xbf16, #tpu.memory_space<vmem>>, vector<32x32xbf16>
    %c0_5 = arith.constant 0 : index
    %c0_6 = arith.constant 0 : index
    %3 = vector.load %arg6[%c0_5, %c0_6] : memref<32x32xbf16, #tpu.memory_space<vmem>>, vector<32x32xbf16>
    %c0_7 = arith.constant 0 : index
    %c0_8 = arith.constant 0 : index
    %4 = vector.load %arg8[%c0_7, %c0_8] : memref<32x32xbf16, #tpu.memory_space<vmem>>, vector<32x32xbf16>
    %c0_9 = arith.constant 0 : index
    %c0_10 = arith.constant 0 : index
    %5 = vector.load %arg10[%c0_9, %c0_10] : memref<32x16xbf16, #tpu.memory_space<vmem>>, vector<32x16xbf16>
    %c0_11 = arith.constant 0 : index
    %c0_12 = arith.constant 0 : index
    %6 = vector.load %arg3[%c0_11, %c0_12] : memref<1x32xf32, #tpu.memory_space<vmem>>, vector<1x32xf32>
    %7 = vector.shape_cast %6 : vector<1x32xf32> to vector<1x32xf32>
    %8 = vector.broadcast %7 : vector<1x32xf32> to vector<8x32xf32>
    %c0_13 = arith.constant 0 : index
    %c0_14 = arith.constant 0 : index
    %9 = vector.load %arg5[%c0_13, %c0_14] : memref<1x32xf32, #tpu.memory_space<vmem>>, vector<1x32xf32>
    %10 = vector.shape_cast %9 : vector<1x32xf32> to vector<1x32xf32>
    %11 = vector.broadcast %10 : vector<1x32xf32> to vector<8x32xf32>
    %c0_15 = arith.constant 0 : index
    %c0_16 = arith.constant 0 : index
    %12 = vector.load %arg7[%c0_15, %c0_16] : memref<1x32xf32, #tpu.memory_space<vmem>>, vector<1x32xf32>
    %13 = vector.shape_cast %12 : vector<1x32xf32> to vector<1x32xf32>
    %14 = vector.broadcast %13 : vector<1x32xf32> to vector<8x32xf32>
    %c0_17 = arith.constant 0 : index
    %c0_18 = arith.constant 0 : index
    %15 = vector.load %arg9[%c0_17, %c0_18] : memref<1x32xf32, #tpu.memory_space<vmem>>, vector<1x32xf32>
    %16 = vector.shape_cast %15 : vector<1x32xf32> to vector<1x32xf32>
    %17 = vector.broadcast %16 : vector<1x32xf32> to vector<8x32xf32>
    %c0_19 = arith.constant 0 : index
    %c0_20 = arith.constant 0 : index
    %18 = vector.load %arg11[%c0_19, %c0_20] : memref<1x16xf32, #tpu.memory_space<vmem>>, vector<1x16xf32>
    %19 = vector.shape_cast %18 : vector<1x16xf32> to vector<1x16xf32>
    %20 = vector.broadcast %19 : vector<1x16xf32> to vector<8x16xf32>
    %c0_21 = arith.constant 0 : index
    %c0_22 = arith.constant 0 : index
    %21 = vector.load %arg12[%c0_21, %c0_22] : memref<4x128xf32, #tpu.memory_space<vmem>>, vector<1x128xf32>
    %22 = vector.shape_cast %21 : vector<1x128xf32> to vector<1x128xf32>
    %23 = vector.broadcast %22 : vector<1x128xf32> to vector<8x128xf32>
    %c1 = arith.constant 1 : index
    %c0_23 = arith.constant 0 : index
    %24 = vector.load %arg12[%c1, %c0_23] : memref<4x128xf32, #tpu.memory_space<vmem>>, vector<1x128xf32>
    %25 = vector.shape_cast %24 : vector<1x128xf32> to vector<1x128xf32>
    %26 = vector.broadcast %25 : vector<1x128xf32> to vector<8x128xf32>
    %c2 = arith.constant 2 : index
    %c0_24 = arith.constant 0 : index
    %27 = vector.load %arg12[%c2, %c0_24] : memref<4x128xf32, #tpu.memory_space<vmem>>, vector<1x128xf32>
    %28 = vector.shape_cast %27 : vector<1x128xf32> to vector<1x128xf32>
    %29 = vector.broadcast %28 : vector<1x128xf32> to vector<8x128xf32>
    %c3 = arith.constant 3 : index
    %c0_25 = arith.constant 0 : index
    %30 = vector.load %arg12[%c3, %c0_25] : memref<4x128xf32, #tpu.memory_space<vmem>>, vector<1x128xf32>
    %31 = vector.shape_cast %30 : vector<1x128xf32> to vector<1x128xf32>
    %32 = vector.broadcast %31 : vector<1x128xf32> to vector<8x128xf32>
    %33 = tpu.iota {dimensions = array<i32: 1>} : vector<8x128xi32>
    %c16_i32 = arith.constant 16 : i32
    %34 = vector.broadcast %c16_i32 : i32 to vector<8x128xi32>
    %35 = arith.cmpi slt, %33, %34 : vector<8x128xi32>
    %cst = arith.constant -1.000000e+00 : f32
    %cst_26 = arith.constant 1.000000e+00 : f32
    %36 = vector.broadcast %cst : f32 to vector<8x128xf32>
    %37 = vector.broadcast %cst_26 : f32 to vector<8x128xf32>
    %38 = arith.select %35, %36, %37 : vector<8x128xi1>, vector<8x128xf32>
    %39 = arith.truncf %0 : vector<8x128xf32> to vector<8x128xbf16>
    %cst_27 = arith.constant dense<0.000000e+00> : vector<8x32xf32>
    %40 = tpu.matmul %39, %1, %cst_27 {dimension_numbers = #tpu.dot_dimension_numbers<[1], [0], [0], [1], [0, 0, 1, 1], [], []>} : vector<8x128xbf16>, vector<128x32xbf16>, vector<8x32xf32> -> vector<8x32xf32>
    %41 = arith.addf %40, %8 : vector<8x32xf32>
    %cst_28 = arith.constant 0.000000e+00 : f32
    %42 = vector.broadcast %cst_28 : f32 to vector<8x32xf32>
    %43 = arith.maximumf %41, %42 : vector<8x32xf32>
    %44 = arith.truncf %43 : vector<8x32xf32> to vector<8x32xbf16>
    %cst_29 = arith.constant dense<0.000000e+00> : vector<8x32xf32>
    %45 = tpu.matmul %44, %2, %cst_29 {dimension_numbers = #tpu.dot_dimension_numbers<[1], [0], [0], [1], [0, 0, 1, 1], [], []>} : vector<8x32xbf16>, vector<32x32xbf16>, vector<8x32xf32> -> vector<8x32xf32>
    %46 = arith.addf %45, %11 : vector<8x32xf32>
    %cst_30 = arith.constant 0.000000e+00 : f32
    %47 = vector.broadcast %cst_30 : f32 to vector<8x32xf32>
    %48 = arith.maximumf %46, %47 : vector<8x32xf32>
    %49 = arith.truncf %48 : vector<8x32xf32> to vector<8x32xbf16>
    %cst_31 = arith.constant dense<0.000000e+00> : vector<8x32xf32>
    %50 = tpu.matmul %49, %3, %cst_31 {dimension_numbers = #tpu.dot_dimension_numbers<[1], [0], [0], [1], [0, 0, 1, 1], [], []>} : vector<8x32xbf16>, vector<32x32xbf16>, vector<8x32xf32> -> vector<8x32xf32>
    %51 = arith.addf %50, %14 : vector<8x32xf32>
    %cst_32 = arith.constant 0.000000e+00 : f32
    %52 = vector.broadcast %cst_32 : f32 to vector<8x32xf32>
    %53 = arith.maximumf %51, %52 : vector<8x32xf32>
    %54 = arith.truncf %53 : vector<8x32xf32> to vector<8x32xbf16>
    %cst_33 = arith.constant dense<0.000000e+00> : vector<8x32xf32>
    %55 = tpu.matmul %54, %4, %cst_33 {dimension_numbers = #tpu.dot_dimension_numbers<[1], [0], [0], [1], [0, 0, 1, 1], [], []>} : vector<8x32xbf16>, vector<32x32xbf16>, vector<8x32xf32> -> vector<8x32xf32>
    %56 = arith.addf %55, %17 : vector<8x32xf32>
    %cst_34 = arith.constant 0.000000e+00 : f32
    %57 = vector.broadcast %cst_34 : f32 to vector<8x32xf32>
    %58 = arith.maximumf %56, %57 : vector<8x32xf32>
    %59 = arith.truncf %58 : vector<8x32xf32> to vector<8x32xbf16>
    %cst_35 = arith.constant dense<0.000000e+00> : vector<8x16xf32>
    %60 = tpu.matmul %59, %5, %cst_35 {dimension_numbers = #tpu.dot_dimension_numbers<[1], [0], [0], [1], [0, 0, 1, 1], [], []>} : vector<8x32xbf16>, vector<32x16xbf16>, vector<8x16xf32> -> vector<8x16xf32>
    %61 = arith.addf %60, %20 : vector<8x16xf32>
    %cst_36 = arith.constant 0.000000e+00 : f32
    %62 = vector.broadcast %cst_36 : f32 to vector<8x16xf32>
    %63 = arith.maximumf %61, %62 : vector<8x16xf32>
    %64 = vector.extract_strided_slice %63 {offsets = [0, 0], sizes = [8, 4], strides = [1, 1]} : vector<8x16xf32> to vector<8x4xf32>
    %65 = vector.extract_strided_slice %63 {offsets = [0, 4], sizes = [8, 4], strides = [1, 1]} : vector<8x16xf32> to vector<8x4xf32>
    %66 = arith.addf %64, %65 : vector<8x4xf32>
    %67 = vector.extract_strided_slice %63 {offsets = [0, 8], sizes = [8, 4], strides = [1, 1]} : vector<8x16xf32> to vector<8x4xf32>
    %68 = arith.addf %66, %67 : vector<8x4xf32>
    %69 = vector.extract_strided_slice %63 {offsets = [0, 12], sizes = [8, 4], strides = [1, 1]} : vector<8x16xf32> to vector<8x4xf32>
    %70 = arith.addf %68, %69 : vector<8x4xf32>
    %71 = vector.extract_strided_slice %70 {offsets = [0, 0], sizes = [8, 1], strides = [1, 1]} : vector<8x4xf32> to vector<8x1xf32>
    %72 = vector.broadcast %71 : vector<8x1xf32> to vector<8x128xf32>
    %73 = arith.mulf %72, %23 : vector<8x128xf32>
    %74 = vector.extract_strided_slice %70 {offsets = [0, 1], sizes = [8, 1], strides = [1, 1]} : vector<8x4xf32> to vector<8x1xf32>
    %75 = vector.broadcast %74 : vector<8x1xf32> to vector<8x128xf32>
    %76 = arith.mulf %75, %26 : vector<8x128xf32>
    %77 = arith.addf %73, %76 : vector<8x128xf32>
    %78 = vector.extract_strided_slice %70 {offsets = [0, 2], sizes = [8, 1], strides = [1, 1]} : vector<8x4xf32> to vector<8x1xf32>
    %79 = vector.broadcast %78 : vector<8x1xf32> to vector<8x128xf32>
    %80 = arith.mulf %79, %29 : vector<8x128xf32>
    %81 = arith.addf %77, %80 : vector<8x128xf32>
    %82 = vector.extract_strided_slice %70 {offsets = [0, 3], sizes = [8, 1], strides = [1, 1]} : vector<8x4xf32> to vector<8x1xf32>
    %83 = vector.broadcast %82 : vector<8x1xf32> to vector<8x128xf32>
    %84 = arith.mulf %83, %32 : vector<8x128xf32>
    %85 = arith.addf %81, %84 : vector<8x128xf32>
    %86 = arith.mulf %38, %85 : vector<8x128xf32>
    %87 = arith.addf %0, %86 : vector<8x128xf32>
    %88 = arith.truncf %87 : vector<8x128xf32> to vector<8x128xbf16>
    %cst_37 = arith.constant dense<0.000000e+00> : vector<8x32xf32>
    %89 = tpu.matmul %88, %1, %cst_37 {dimension_numbers = #tpu.dot_dimension_numbers<[1], [0], [0], [1], [0, 0, 1, 1], [], []>} : vector<8x128xbf16>, vector<128x32xbf16>, vector<8x32xf32> -> vector<8x32xf32>
    %90 = arith.addf %89, %8 : vector<8x32xf32>
    %cst_38 = arith.constant 0.000000e+00 : f32
    %91 = vector.broadcast %cst_38 : f32 to vector<8x32xf32>
    %92 = arith.maximumf %90, %91 : vector<8x32xf32>
    %93 = arith.truncf %92 : vector<8x32xf32> to vector<8x32xbf16>
    %cst_39 = arith.constant dense<0.000000e+00> : vector<8x32xf32>
    %94 = tpu.matmul %93, %2, %cst_39 {dimension_numbers = #tpu.dot_dimension_numbers<[1], [0], [0], [1], [0, 0, 1, 1], [], []>} : vector<8x32xbf16>, vector<32x32xbf16>, vector<8x32xf32> -> vector<8x32xf32>
    %95 = arith.addf %94, %11 : vector<8x32xf32>
    %cst_40 = arith.constant 0.000000e+00 : f32
    %96 = vector.broadcast %cst_40 : f32 to vector<8x32xf32>
    %97 = arith.maximumf %95, %96 : vector<8x32xf32>
    %98 = arith.truncf %97 : vector<8x32xf32> to vector<8x32xbf16>
    %cst_41 = arith.constant dense<0.000000e+00> : vector<8x32xf32>
    %99 = tpu.matmul %98, %3, %cst_41 {dimension_numbers = #tpu.dot_dimension_numbers<[1], [0], [0], [1], [0, 0, 1, 1], [], []>} : vector<8x32xbf16>, vector<32x32xbf16>, vector<8x32xf32> -> vector<8x32xf32>
    %100 = arith.addf %99, %14 : vector<8x32xf32>
    %cst_42 = arith.constant 0.000000e+00 : f32
    %101 = vector.broadcast %cst_42 : f32 to vector<8x32xf32>
    %102 = arith.maximumf %100, %101 : vector<8x32xf32>
    %103 = arith.truncf %102 : vector<8x32xf32> to vector<8x32xbf16>
    %cst_43 = arith.constant dense<0.000000e+00> : vector<8x32xf32>
    %104 = tpu.matmul %103, %4, %cst_43 {dimension_numbers = #tpu.dot_dimension_numbers<[1], [0], [0], [1], [0, 0, 1, 1], [], []>} : vector<8x32xbf16>, vector<32x32xbf16>, vector<8x32xf32> -> vector<8x32xf32>
    %105 = arith.addf %104, %17 : vector<8x32xf32>
    %cst_44 = arith.constant 0.000000e+00 : f32
    %106 = vector.broadcast %cst_44 : f32 to vector<8x32xf32>
    %107 = arith.maximumf %105, %106 : vector<8x32xf32>
    %108 = arith.truncf %107 : vector<8x32xf32> to vector<8x32xbf16>
    %cst_45 = arith.constant dense<0.000000e+00> : vector<8x16xf32>
    %109 = tpu.matmul %108, %5, %cst_45 {dimension_numbers = #tpu.dot_dimension_numbers<[1], [0], [0], [1], [0, 0, 1, 1], [], []>} : vector<8x32xbf16>, vector<32x16xbf16>, vector<8x16xf32> -> vector<8x16xf32>
    %110 = arith.addf %109, %20 : vector<8x16xf32>
    %cst_46 = arith.constant 0.000000e+00 : f32
    %111 = vector.broadcast %cst_46 : f32 to vector<8x16xf32>
    %112 = arith.maximumf %110, %111 : vector<8x16xf32>
    %113 = vector.extract_strided_slice %112 {offsets = [0, 0], sizes = [8, 4], strides = [1, 1]} : vector<8x16xf32> to vector<8x4xf32>
    %114 = vector.extract_strided_slice %112 {offsets = [0, 4], sizes = [8, 4], strides = [1, 1]} : vector<8x16xf32> to vector<8x4xf32>
    %115 = arith.addf %113, %114 : vector<8x4xf32>
    %116 = vector.extract_strided_slice %112 {offsets = [0, 8], sizes = [8, 4], strides = [1, 1]} : vector<8x16xf32> to vector<8x4xf32>
    %117 = arith.addf %115, %116 : vector<8x4xf32>
    %118 = vector.extract_strided_slice %112 {offsets = [0, 12], sizes = [8, 4], strides = [1, 1]} : vector<8x16xf32> to vector<8x4xf32>
    %119 = arith.addf %117, %118 : vector<8x4xf32>
    %120 = vector.extract_strided_slice %119 {offsets = [0, 0], sizes = [8, 1], strides = [1, 1]} : vector<8x4xf32> to vector<8x1xf32>
    %121 = vector.broadcast %120 : vector<8x1xf32> to vector<8x128xf32>
    %122 = arith.mulf %121, %23 : vector<8x128xf32>
    %123 = vector.extract_strided_slice %119 {offsets = [0, 1], sizes = [8, 1], strides = [1, 1]} : vector<8x4xf32> to vector<8x1xf32>
    %124 = vector.broadcast %123 : vector<8x1xf32> to vector<8x128xf32>
    %125 = arith.mulf %124, %26 : vector<8x128xf32>
    %126 = arith.addf %122, %125 : vector<8x128xf32>
    %127 = vector.extract_strided_slice %119 {offsets = [0, 2], sizes = [8, 1], strides = [1, 1]} : vector<8x4xf32> to vector<8x1xf32>
    %128 = vector.broadcast %127 : vector<8x1xf32> to vector<8x128xf32>
    %129 = arith.mulf %128, %29 : vector<8x128xf32>
    %130 = arith.addf %126, %129 : vector<8x128xf32>
    %131 = vector.extract_strided_slice %119 {offsets = [0, 3], sizes = [8, 1], strides = [1, 1]} : vector<8x4xf32> to vector<8x1xf32>
    %132 = vector.broadcast %131 : vector<8x1xf32> to vector<8x128xf32>
    %133 = arith.mulf %132, %32 : vector<8x128xf32>
    %134 = arith.addf %130, %133 : vector<8x128xf32>
    %135 = arith.mulf %38, %134 : vector<8x128xf32>
    %136 = arith.addf %87, %135 : vector<8x128xf32>
    %c0_47 = arith.constant 0 : index
    %c0_48 = arith.constant 0 : index
    %137 = vector.load %arg13[%c0_47, %c0_48] : memref<8x128xf32, #tpu.memory_space<vmem>>, vector<8x128xf32>
    tpu.vector_store %arg13[%c0_47, %c0_48], %136 {strides = array<i32>} : memref<8x128xf32, #tpu.memory_space<vmem>>, vector<8x128xf32>,
    return
  }
  func.func @transform_0(%arg0: i32) -> (i32, i32) {
    %c0_i32 = arith.constant 0 : i32
    %c0_i32_0 = arith.constant 0 : i32
    return %arg0, %c0_i32 : i32, i32
  }
  func.func @transform_1(%arg0: i32) -> (i32, i32) {
    %c0_i32 = arith.constant 0 : i32
    %c0_i32_0 = arith.constant 0 : i32
    %c0_i32_1 = arith.constant 0 : i32
    return %c0_i32, %c0_i32_0 : i32, i32
  }
  func.func @transform_2(%arg0: i32) -> (i32, i32) {
    %c0_i32 = arith.constant 0 : i32
    %c0_i32_0 = arith.constant 0 : i32
    %c0_i32_1 = arith.constant 0 : i32
    return %c0_i32, %c0_i32_0 : i32, i32
  }
  func.func @transform_3(%arg0: i32) -> (i32, i32) {
    %c0_i32 = arith.constant 0 : i32
    %c0_i32_0 = arith.constant 0 : i32
    %c0_i32_1 = arith.constant 0 : i32
    return %c0_i32, %c0_i32_0 : i32, i32
  }
  func.func @transform_4(%arg0: i32) -> (i32, i32) {
    %c0_i32 = arith.constant 0 : i32
    %c0_i32_0 = arith.constant 0 : i32
    %c0_i32_1 = arith.constant 0 : i32
    return %c0_i32, %c0_i32_0 : i32, i32
  }
  func.func @transform_5(%arg0: i32) -> (i32, i32) {
    %c0_i32 = arith.constant 0 : i32
    %c0_i32_0 = arith.constant 0 : i32
    %c0_i32_1 = arith.constant 0 : i32
    return %c0_i32, %c0_i32_0 : i32, i32
  }
  func.func @transform_6(%arg0: i32) -> (i32, i32) {
    %c0_i32 = arith.constant 0 : i32
    %c0_i32_0 = arith.constant 0 : i32
    %c0_i32_1 = arith.constant 0 : i32
    return %c0_i32, %c0_i32_0 : i32, i32
  }
  func.func @transform_7(%arg0: i32) -> (i32, i32) {
    %c0_i32 = arith.constant 0 : i32
    %c0_i32_0 = arith.constant 0 : i32
    %c0_i32_1 = arith.constant 0 : i32
    return %c0_i32, %c0_i32_0 : i32, i32
  }
  func.func @transform_8(%arg0: i32) -> (i32, i32) {
    %c0_i32 = arith.constant 0 : i32
    %c0_i32_0 = arith.constant 0 : i32
    %c0_i32_1 = arith.constant 0 : i32
    return %c0_i32, %c0_i32_0 : i32, i32
  }
  func.func @transform_9(%arg0: i32) -> (i32, i32) {
    %c0_i32 = arith.constant 0 : i32
    %c0_i32_0 = arith.constant 0 : i32
    %c0_i32_1 = arith.constant 0 : i32
    return %c0_i32, %c0_i32_0 : i32, i32
  }
  func.func @transform_10(%arg0: i32) -> (i32, i32) {
    %c0_i32 = arith.constant 0 : i32
    %c0_i32_0 = arith.constant 0 : i32
    %c0_i32_1 = arith.constant 0 : i32
    return %c0_i32, %c0_i32_0 : i32, i32
  }
  func.func @transform_11(%arg0: i32) -> (i32, i32) {
    %c0_i32 = arith.constant 0 : i32
    %c0_i32_0 = arith.constant 0 : i32
    %c0_i32_1 = arith.constant 0 : i32
    return %c0_i32, %c0_i32_0 : i32, i32
  }
  func.func @transform_12(%arg0: i32) -> (i32, i32) {
    %c0_i32 = arith.constant 0 : i32
    %c0_i32_0 = arith.constant 0 : i32
    return %arg0, %c0_i32 : i32, i32
  }
}

</mosaic_0001>

<bundles_post_ra>
// kernel: tpu_custom_call.1
= control target key start
LH: loop header
LB: loop body
LE: loop exit
PB: predicated region body
PF: predicated region fallthrough
CT: control target
= control target key end

     0   :  { %s832_s0 = inlined_call_operand.vmem [shape: f32[8,128], index: 0, kind: input, shape index: {}]   ;;  %s833_s1 = inlined_call_operand.vmem [shape: bf16[128,32], index: 1, kind: input, shape index: {}]   ;;  %s834_s2 = inlined_call_operand.vmem [shape: f32[1,32], index: 2, kind: input, shape index: {}]   ;;  %s835_s3 = inlined_call_operand.vmem [shape: bf16[32,32], index: 3, kind: input, shape index: {}]   ;;  %s836_s4 = inlined_call_operand.vmem [shape: f32[1,32], index: 4, kind: input, shape index: {}]   ;;  %s837_s5 = inlined_call_operand.vmem [shape: bf16[32,32], index: 5, kind: input, shape index: {}]   ;;  %s838_s6 = inlined_call_operand.vmem [shape: f32[1,32], index: 6, kind: input, shape index: {}]   ;;  %s839_s7 = inlined_call_operand.vmem [shape: bf16[32,32], index: 7, kind: input, shape index: {}]   ;;  %s840_s8 = inlined_call_operand.vmem [shape: f32[1,32], index: 8, kind: input, shape index: {}]   ;;  %s841_s9 = inlined_call_operand.vmem [shape: bf16[32,16], index: 9, kind: input, shape index: {}]   ;;  %s842_s10 = inlined_call_operand.vmem [shape: f32[1,16], index: 10, kind: input, shape index: {}]   ;;  %s843_s11 = inlined_call_operand.vmem [shape: f32[4,128], index: 11, kind: input, shape index: {}]   ;;  %s844_s12 = inlined_call_operand.hbm [shape: f32[8,128], index: 12, kind: output, shape index: {}]  }
   0x1   :  { %v553_v0 = vld [vmem:[%s833_s1 + $0x38] sm:$0xff]  ;;  %v552_v1 = vld [vmem:[%s833_s1 + $0x30] sm:$0xff]  ;;  %v551_v2 = vld [vmem:[%s833_s1 + $0x28] sm:$0xff] }
   0x2   :  { %157 = vmatpush.bf16.msra.mxu0 %v553_v0 }
   0x6   :  { %158 = vmatpush.bf16.msra.mxu0 %v552_v1 }
   0x7   :  { %17 = vsyncpa [#allocation3], 0  ;;  %v550_v3 = vld [vmem:[%s833_s1 + $0x20] sm:$0xff]  ;;  %v549_v4 = vld [vmem:[%s833_s1 + $0x18] sm:$0xff]  ;;  %vm184_vm0 = vcmask 261120   ;;  %s615_s20 = smov 116   ;;  %v104_v58 = vlaneseq }
   0x8   :  { %v548_v5 = vld [vmem:[%s833_s1 + $0x10] sm:$0xff]  ;;  %v547_v6 = vld [vmem:[%s833_s1 + $0x8] sm:$0xff]  ;;  %v546_v7 = vld [vmem:[%s833_s1] sm:$0xff]  ;;  %s617_s21 = smov 120   ;;  %v618_v47 = vmov 3   ;;  %v619_v48 = vmov 1  }
   0x9   :  { %v716_v8 = vld [vmem:[%s832_s0] sm:$0xff]  ;;  %v555_v10 = vld [vmem:[%s835_s3 + $0x8] sm:$0xff]  ;;  %574 = vset.pattern.permute.xlu0 %v618_v47  ;;  %572 = vset.pattern.permute.xlu2 %v619_v48  ;;  %v620_v49 = vmov 0   ;;  %v621_v56 = vmov 2   ;;  %v105_v62 = vand.u32 127, %v104_v58  ;;  %s465_s28 = sshll.u32 %s844_s12, 4  ;;  %s466_s28 = int_to_ptr.hbm [resolvable:$true] %s465_s28 }
   0xa   :  { %159 = vmatpush.bf16.msra.mxu0 %v551_v2  ;;  %v108_v9 = vpack.c.bf16 %v716_v8, %v716_v8  ;;  %194 = vmatpush.bf16.msra.mxu1 %v555_v10  ;;  %v554_v11 = vld [vmem:[%s835_s3] sm:$0xff]  ;;  %v557_v18 = vld [vmem:[%s837_s5 + $0x8] sm:$0xff] }
   0xb   :  { %v729_v12 = vld [vmem:[%s834_s2] ss:$0 sm:$0xff]  ;;  %224 = vmatpush.bf16.msra.mxu2 %v557_v18  ;;  %v559_v26 = vld [vmem:[%s839_s7 + $0x8] sm:$0xff]  ;;  %571 = vset.pattern.permute.xlu1 %v620_v49  ;;  %v785_v59 = vld [vmem:[%s843_s11 + $0x1] ss:$0 sm:$0xff]  ;;  %vm106_vm1 = vcmp.lt.s32.totalorder %v105_v62, 16 }
   0xc   :  { %v556_v19 = vld [vmem:[%s837_s5] sm:$0xff]  ;;  %254 = vmatpush.bf16.msra.mxu3 %v559_v26  ;;  %v561_v28 = vld [vmem:[%s841_s9 + $0x8] sm:$0xff] }
   0xd   :  { %v742_v20 = vld [vmem:[%s836_s4] ss:$0 sm:$0xff]  ;;  %v795_v61 = vld [vmem:[%s843_s11 + $0x2] ss:$0 sm:$0xff] }
   0xe   :  { %160 = vmatpush.bf16.msra.mxu0 %v550_v3  ;;  %195 = vmatpush.bf16.msra.mxu1 %v554_v11  ;;  %v558_v27 = vld [vmem:[%s839_s7] sm:$0xff] }
   0xf   :  { %225 = vmatpush.bf16.msra.mxu2 %v556_v19  ;;  %v560_v29 = vld [vmem:[%s841_s9] sm:$0xff] }
  0x10   :  { %255 = vmatpush.bf16.msra.mxu3 %v558_v27  ;;  %v761_v30 = vld [vmem:[%s838_s6] ss:$0 sm:$0xff] }
  0x11   :  { %v768_v36 = vld [vmem:[%s840_s8] ss:$0 sm:$0xff]  ;;  %s616_s8 = smov 124  }
  0x12   :  { %161 = vmatpush.bf16.msra.mxu0 %v549_v4  ;;  %284 = vmatpush.bf16.msrb.mxu1 %v561_v28  ;;  %v775_v42 = vld [vmem:[%s842_s10] ss:$0 sm:$0xff] }
  0x13   :  { %332 = vmatpush.bf16.msrb.mxu2 %v553_v0  ;;  %v790_v60 = vld [vmem:[%s843_s11] ss:$0 sm:$0xff] }
  0x14   :  { %356 = vmatpush.bf16.msrb.mxu3 %v555_v10  ;;  %v622_v10 = vmov 1.0  }
  0x16   :  { %162 = vmatpush.bf16.msra.mxu0 %v548_v5  ;;  %285 = vmatpush.bf16.msrb.mxu1 %v560_v29 }
  0x17   :  { %333 = vmatpush.bf16.msrb.mxu2 %v552_v1 }
  0x18   :  { %357 = vmatpush.bf16.msrb.mxu3 %v554_v11  ;;  %v806_v11 = vsel %vm106_vm1, -1.0, %v622_v10 }
  0x1a   :  { %163 = vmatpush.bf16.msra.mxu0 %v547_v6 }
  0x1b   :  { %334 = vmatpush.bf16.msrb.mxu2 %v551_v2  ;;  %v801_v2 = vld [vmem:[%s843_s11 + $0x3] ss:$0 sm:$0xff]  ;;  %s623_s11 = smov [#allocation2]  }
  0x1c   :  { %s463_s3 = sshll.u32 %s623_s11, 4  ;;  %s464_s3 = int_to_ptr.vmem [resolvable:$true] %s463_s3 }
  0x1e   :  { %164 = vmatpush.bf16.msra.mxu0 %v546_v7 }
  0x1f   :  { %335 = vmatpush.bf16.msrb.mxu2 %v550_v3 }
  0x21   :  { %165 = vmatmul.bf16.vlgmr.msra.gmra.mxu0 %v108_v9 }
  0x22   :  { %410 = vmatpush.bf16.msrb.mxu0 %v561_v28 }
  0x23   :  { %336 = vmatpush.bf16.msrb.mxu2 %v549_v4 }
  0x26   :  { %411 = vmatpush.bf16.msrb.mxu0 %v560_v29 }
  0x27   :  { %337 = vmatpush.bf16.msrb.mxu2 %v548_v5 }
  0x2b   :  { %338 = vmatpush.bf16.msrb.mxu2 %v547_v6 }
  0x2f   :  { %339 = vmatpush.bf16.msrb.mxu2 %v546_v7 }
  0x9e   :  { %v166_v13 = vpop.f32.mrf.mxu0 }
  0x9f   :  { %v167_v14 = vadd.f32 %v729_v12, %v166_v13 }
  0xa1   :  { %v170_v15 = vmax.f32 %v167_v14, 0.0 }
  0xa3   :  { %v171_v16 = vpack.c.bf16 %v170_v15, %v170_v15 }
  0xa5   :  { %514 = vmatmul.msk.bf16.vlgmr.msra.gmra.mxu1 %vm184_vm0, %v171_v16 }
  0xa6   :  { %v168_v17 = vpop.f32.mrf.mxu0  ;;  %374 = vmatpush.bf16.msra.mxu1 %v557_v18 }
  0xaa   :  { %375 = vmatpush.bf16.msra.mxu1 %v556_v19 }
 0x122   :  { %v197_v21 = vpop.f32.mrf.mxu1 }
 0x123   :  { %v198_v22 = vadd.f32 %v742_v20, %v197_v21 }
 0x125   :  { %v201_v23 = vmax.f32 %v198_v22, 0.0 }
 0x127   :  { %v202_v24 = vpack.c.bf16 %v201_v23, %v201_v23 }
 0x129   :  { %523 = vmatmul.msk.bf16.vlgmr.msra.gmra.mxu2 %vm184_vm0, %v202_v24 }
 0x12a   :  { %v199_v25 = vpop.f32.mrf.mxu1 }
 0x1ac   :  { %v227_v31 = vpop.f32.mrf.mxu2 }
 0x1ad   :  { %v228_v32 = vadd.f32 %v761_v30, %v227_v31 }
 0x1af   :  { %v231_v33 = vmax.f32 %v228_v32, 0.0 }
 0x1b1   :  { %v232_v34 = vpack.c.bf16 %v231_v33, %v231_v33 }
 0x1b3   :  { %532 = vmatmul.msk.bf16.vlgmr.msra.gmra.mxu3 %vm184_vm0, %v232_v34 }
 0x1b4   :  { %v229_v35 = vpop.f32.mrf.mxu2  ;;  %392 = vmatpush.bf16.msra.mxu3 %v559_v26 }
 0x1b8   :  { %393 = vmatpush.bf16.msra.mxu3 %v558_v27 }
 0x236   :  { %v257_v37 = vpop.f32.mrf.mxu3 }
 0x237   :  { %v258_v38 = vadd.f32 %v768_v36, %v257_v37 }
 0x239   :  { %v261_v39 = vmax.f32 %v258_v38, 0.0 }
 0x23b   :  { %v262_v40 = vpack.c.bf16 %v261_v39, %v261_v39 }
 0x23d   :  { %541 = vmatmul.msk.bf16.vlgmr.msrb.gmra.mxu1 %vm184_vm0, %v262_v40 }
 0x23e   :  { %v259_v41 = vpop.f32.mrf.mxu3 }
 0x2ba   :  { %v287_v43 = vpop.f32.mrf.mxu1 }
 0x2bb   :  { %v288_v44 = vadd.f32 %v775_v42, %v287_v43 }
 0x2bd   :  { %v291_v45 = vmax.f32 %v288_v44, 0.0 }
 0x2bf   :  { %301 = vrot.lane.b32.xlu1 %v291_v45, %s615_s20  ;;  %293 = vrot.lane.b32.xlu0 %v291_v45, %s616_s8 }
 0x2c2   :  { %v289_v46 = vpop.f32.mrf.mxu1 }
 0x2c7   :  { %297 = vrot.lane.b32.xlu0 %v291_v45, %s617_s21 }
 0x331   :  { %v294_v50 = vpop.permute.xlu0 %293  ;;  %v302_v54 = vpop.permute.xlu1 %301 }
 0x332   :  { %v296_v51 = vadd.f32 %v294_v50, %v291_v45 }
 0x339   :  { %v298_v52 = vpop.permute.xlu0 %297 }
 0x33a   :  { %v300_v53 = vadd.f32 %v298_v52, %v296_v51 }
 0x33c   :  { %v304_v55 = vadd.f32 %v302_v54, %v300_v53 }
 0x33e   :  { %324 = vperm.xlu0 %574, %v304_v55   ;;  %312 = vperm.xlu2 %572, %v304_v55  }
 0x33f   :  { %307 = vperm.xlu1 %571, %v304_v55  }
 0x346   :  { %573 = vset.pattern.permute.xlu2 %v621_v56  ;;  %576 = vset.pattern.permute.xlu0 %v619_v48 }
 0x347   :  { %318 = vperm.xlu2 %573, %v304_v55   ;;  %577 = vset.pattern.permute.xlu1 %v621_v56 }
 0x34f   :  { %575 = vset.pattern.permute.xlu2 %v620_v49 }
 0x398   :  { %v313_v57 = vpop.permute.xlu2 %312 }
 0x399   :  { %v315_v1 = vmul.f32 %v785_v59, %v313_v57 }
 0x3a1   :  { %v319_v63 = vpop.permute.xlu2 %318 }
 0x3a2   :  { %v321_v5 = vmul.f32 %v795_v61, %v319_v63 }
 0x3b0   :  { %v325_v4 = vpop.permute.xlu0 %324 }
 0x3b1   :  { %v308_v0 = vpop.permute.xlu1 %307  ;;  %v327_v7 = vmul.f32 %v801_v2, %v325_v4 }
 0x3b2   :  { %v310_v3 = vmul.f32 %v790_v60, %v308_v0 }
 0x3b4   :  { %v316_v6 = vadd.f32 %v315_v1, %v310_v3 }
 0x3b6   :  { %v322_v9 = vadd.f32 %v321_v5, %v316_v6 }
 0x3b8   :  { %v328_v13 = vadd.f32 %v327_v7, %v322_v9 }
 0x3ba   :  { %v329_v14 = vmul.f32 %v328_v13, %v806_v11 }
 0x3bc   :  { %v330_v15 = vadd.f32 %v329_v14, %v716_v8 }
 0x3be   :  { %v331_v16 = vpack.c.bf16 %v330_v15, %v330_v15 }
 0x3c0   :  { %340 = vmatmul.bf16.vlgmr.msrb.gmra.mxu2 %v331_v16 }
 0x443   :  { %v341_v17 = vpop.f32.mrf.mxu2 }
 0x444   :  { %v342_v18 = vadd.f32 %v729_v12, %v341_v17 }
 0x446   :  { %v345_v19 = vmax.f32 %v342_v18, 0.0 }
 0x448   :  { %v346_v21 = vpack.c.bf16 %v345_v19, %v345_v19 }
 0x44a   :  { %542 = vmatmul.msk.bf16.vlgmr.msrb.gmra.mxu3 %vm184_vm0, %v346_v21 }
 0x44b   :  { %v343_v22 = vpop.f32.mrf.mxu2 }
 0x4cd   :  { %v359_v23 = vpop.f32.mrf.mxu3 }
 0x4ce   :  { %v360_v24 = vadd.f32 %v742_v20, %v359_v23 }
 0x4d0   :  { %v363_v25 = vmax.f32 %v360_v24, 0.0 }
 0x4d2   :  { %v364_v26 = vpack.c.bf16 %v363_v25, %v363_v25 }
 0x4d4   :  { %543 = vmatmul.msk.bf16.vlgmr.msra.gmra.mxu1 %vm184_vm0, %v364_v26 }
 0x4d5   :  { %v361_v27 = vpop.f32.mrf.mxu3 }
 0x551   :  { %v377_v28 = vpop.f32.mrf.mxu1 }
 0x552   :  { %v378_v8 = vadd.f32 %v761_v30, %v377_v28 }
 0x554   :  { %v381_v29 = vmax.f32 %v378_v8, 0.0 }
 0x556   :  { %v382_v31 = vpack.c.bf16 %v381_v29, %v381_v29 }
 0x558   :  { %544 = vmatmul.msk.bf16.vlgmr.msra.gmra.mxu3 %vm184_vm0, %v382_v31 }
 0x559   :  { %v379_v12 = vpop.f32.mrf.mxu1 }
 0x5db   :  { %v395_v32 = vpop.f32.mrf.mxu3 }
 0x5dc   :  { %v396_v33 = vadd.f32 %v768_v36, %v395_v32 }
 0x5de   :  { %v399_v34 = vmax.f32 %v396_v33, 0.0 }
 0x5e0   :  { %v400_v35 = vpack.c.bf16 %v399_v34, %v399_v34 }
 0x5e2   :  { %545 = vmatmul.msk.bf16.vlgmr.msrb.gmra.mxu0 %vm184_vm0, %v400_v35 }
 0x5e3   :  { %v397_v20 = vpop.f32.mrf.mxu3 }
 0x65f   :  { %v413_v37 = vpop.f32.mrf.mxu0 }
 0x660   :  { %v414_v38 = vadd.f32 %v775_v42, %v413_v37 }
 0x662   :  { %v417_v39 = vmax.f32 %v414_v38, 0.0 }
 0x664   :  { %423 = vrot.lane.b32.xlu2 %v417_v39, %s617_s21  ;;  %419 = vrot.lane.b32.xlu1 %v417_v39, %s616_s8 }
 0x667   :  { %v415_v30 = vpop.f32.mrf.mxu0 }
 0x66c   :  { %427 = vrot.lane.b32.xlu1 %v417_v39, %s615_s20 }
 0x6be   :  { %v424_v43 = vpop.permute.xlu2 %423 }
 0x6d6   :  { %v420_v40 = vpop.permute.xlu1 %419 }
 0x6d7   :  { %v422_v41 = vadd.f32 %v420_v40, %v417_v39 }
 0x6d9   :  { %v426_v36 = vadd.f32 %v424_v43, %v422_v41 }
 0x6de   :  { %v428_v44 = vpop.permute.xlu1 %427 }
 0x6df   :  { %v430_v45 = vadd.f32 %v428_v44, %v426_v36 }
 0x6e1   :  { %444 = vperm.xlu1 %577, %v430_v45   ;;  %438 = vperm.xlu0 %576, %v430_v45  }
 0x6e2   :  { %433 = vperm.xlu2 %575, %v430_v45  }
 0x6e9   :  { %579 = vset.pattern.permute.xlu0 %v618_v47 }
 0x6ea   :  { %578 = vset.pattern.permute.xlu2 %v618_v47 }
 0x6eb   :  { %450 = vperm.xlu2 %578, %v430_v45  }
 0x73c   :  { %v434_v42 = vpop.permute.xlu2 %433 }
 0x73d   :  { %v436_v49 = vmul.f32 %v790_v60, %v434_v42 }
 0x745   :  { %v451_v51 = vpop.permute.xlu2 %450 }
 0x746   :  { %v453_v54 = vmul.f32 %v801_v2, %v451_v51 }
 0x753   :  { %v445_v46 = vpop.permute.xlu1 %444  ;;  %v439_v48 = vpop.permute.xlu0 %438 }
 0x754   :  { %v441_v50 = vmul.f32 %v785_v59, %v439_v48  ;;  %v447_v52 = vmul.f32 %v795_v61, %v445_v46 }
 0x756   :  { %v442_v53 = vadd.f32 %v441_v50, %v436_v49 }
 0x758   :  { %v448_v55 = vadd.f32 %v447_v52, %v442_v53 }
 0x75a   :  { %v454_v56 = vadd.f32 %v453_v54, %v448_v55 }
 0x75c   :  { %v455_v47 = vmul.f32 %v454_v56, %v806_v11 }
 0x75e   :  { %v456_v57 = vadd.f32 %v455_v47, %v330_v15 }
 0x760   :  { %457 = vst [vmem:[#allocation2] sm:$0xff] %v456_v57 }
 0x761   :  { %468 = dma.vmem_to_hbm [thread:$0]  %s464_s3, 128, %s466_s28, [#allocation3]  }
 0x762   :  { %613 = dma.done.wait [#allocation3], 128  }
 0x763   :  { %614 = vsyncadd [#allocation3], 4294967168 }
 0x764   :  { %473 = vsyncpa [#allocation3], 1 }

</bundles_post_ra>
